<compile_context>
chip_gen: v7x
topology: tpu7x:2x2x1
jax: 0.10.0
libtpu: 0.0.40
codegen_flags: <defaults>
</compile_context>

<pallas_src>
import functools

import jax
import jax.numpy as jnp
from jax import lax
from jax.experimental import pallas as pl
from jax.experimental.pallas import tpu as pltpu

_NEG_BIG = -1e30  # finite "minus infinity" for padded class columns


def _round_up(n, m):
    return (n + m - 1) // m * m


def nn_ce_kernel(*refs, n_layers, n_rows, block_b, mask_rows):
    """One batch tile: linear stack -> cross-entropy partial sum.

    refs = [col, x, (w, b) * n_layers, y, partial_out]
    """
    col_ref = refs[0]                          # (1, Hp) int32 class indices
    x_ref = refs[1]                            # (block_b, Hp) compute dtype
    layer_refs = refs[2:2 + 2 * n_layers]
    y_ref = refs[2 + 2 * n_layers]             # (block_b, 1) int32 labels
    out_ref = refs[3 + 2 * n_layers]           # (1, 8, 128) f32 partial sum

    i = pl.program_id(0)

    # ---- Linear stack: act = act @ W_l + b_l (bf16 into MXU, f32 accum) ----
    act = x_ref[...]
    for l in range(n_layers):
        w_ref = layer_refs[2 * l]
        b_ref = layer_refs[2 * l + 1]
        act = jnp.dot(act.astype(w_ref.dtype), w_ref[...],
                      preferred_element_type=jnp.float32) + b_ref[...]
    logits = act                                             # [TB, Hp] f32
    # Padded class columns already sit at ~-1e30 (baked into the final
    # layer's bias padding), so no in-kernel class mask is needed.

    # ---- Cross entropy: nll = (m + logsumexp(logits - m)) - logits[y] ----
    m = jnp.max(logits, axis=-1, keepdims=True)              # [TB, 1]
    lse = jnp.log(jnp.sum(jnp.exp(logits - m), axis=-1, keepdims=True))
    # Label logit via masked-sum select (no full-width logp/onehot temps).
    logit_y = jnp.sum(jnp.where(col_ref[...] == y_ref[...], logits, 0.0),
                      axis=-1, keepdims=True)                # [TB, 1]
    nll = (m + lse) - logit_y                                # [TB, 1]

    if mask_rows:  # static: only compiled when B % block_b != 0
        row = lax.broadcasted_iota(jnp.int32, nll.shape, 0) + i * block_b
        nll = jnp.where(row < n_rows, nll, 0.0)

    out_ref[...] = jnp.broadcast_to(jnp.sum(nll), out_ref.shape).astype(jnp.float32)


@functools.partial(jax.jit, static_argnames=("block_b", "compute_dtype"))
def nn_model_loss(x, params, y, *, block_b=256, compute_dtype=jnp.bfloat16):
    """Mean cross-entropy of a stack of Linear layers, fused in one pallas_call.

    params: sequence of (w, b); w has shape [H, H] stored [in, out], b has [H].
    """
    B, H = x.shape
    n_layers = len(params)

    itemsize = jnp.dtype(compute_dtype).itemsize
    min_sub = {4: 8, 2: 16, 1: 32}[itemsize]      # sublane granularity per dtype

    Hp = _round_up(H, 128)                        # lane-align hidden/class dim
    block_b = _round_up(max(min(block_b, _round_up(B, min_sub)), min_sub), min_sub)
    Bp = _round_up(B, block_b)
    num_tiles = Bp // block_b
    mask_rows = Bp != B

    def pad2(a, rows, cols, value=0):
        return jnp.pad(a, ((0, rows - a.shape[0]), (0, cols - a.shape[1])),
                       constant_values=value)

    xp = pad2(x.astype(jnp.float32), Bp, Hp).astype(compute_dtype)
    yp = pad2(y.reshape(B, 1).astype(jnp.int32), Bp, 1)
    col = jnp.arange(Hp, dtype=jnp.int32).reshape(1, Hp)

    # Constant-index blocks never change -> single buffer (halves their VMEM).
    resident = pl.Buffered(1)

    flat_inputs = [col, xp]
    in_specs = [
        pl.BlockSpec((1, Hp), lambda i: (0, 0), pipeline_mode=resident),
        pl.BlockSpec((block_b, Hp), lambda i: (i, 0)),
    ]
    for l, (w, b) in enumerate(params):
        wp = pad2(w.astype(jnp.float32), Hp, Hp).astype(compute_dtype)
        b_row = b.reshape(1, H).astype(jnp.float32)
        # Bake the padded-class mask into the FINAL layer's bias padding only;
        # intermediate layers' padding must stay 0 (padded activations feed
        # zero weight rows downstream).
        pad_val = _NEG_BIG if l == n_layers - 1 else 0.0
        bp = pad2(b_row, 1, Hp, value=pad_val)
        flat_inputs += [wp, bp]
        in_specs += [
            pl.BlockSpec((Hp, Hp), lambda i: (0, 0), pipeline_mode=resident),
            pl.BlockSpec((1, Hp), lambda i: (0, 0), pipeline_mode=resident),
        ]
    flat_inputs.append(yp)
    in_specs.append(pl.BlockSpec((block_b, 1), lambda i: (i, 0)))

    # ---- VMEM budget: generation-aware (~78% of capacity) + fit guard ----
    try:
        vmem_cap = int(pltpu.get_tpu_info().vmem_capacity_bytes)
    except Exception:
        vmem_cap = 64 << 20                       # conservative (v7x per-core)
    budget = int(vmem_cap * 0.78)

    resident_bytes = n_layers * (Hp * Hp * itemsize + 8 * Hp * 4) + 8 * Hp * 4
    stream_bytes = (2 * block_b * Hp * itemsize        # x tiles (double buffered)
                    + 2 * block_b * 128 * 4            # y tiles (lane-padded)
                    + 2 * 8 * 128 * 4)                 # output partials
    interm_bytes = 4 * block_b * Hp * 4                # f32 activations/temps
    needed = resident_bytes + stream_bytes + interm_bytes + (2 << 20)
    if needed > budget:
        # TODO(synk): fall back to streaming weights over a layer/K grid axis
        # (with class-axis tiling + online logsumexp) instead of erroring.
        raise ValueError(
            f"Resident-weight plan needs ~{needed >> 20} MiB VMEM but only "
            f"~{budget >> 20} MiB is budgeted; reduce block_b / n_layers / h_dim.")
    vmem_bytes = int(min(max(needed, 8 << 20), budget))

    kernel = functools.partial(
        nn_ce_kernel, n_layers=n_layers, n_rows=B, block_b=block_b,
        mask_rows=mask_rows)

    partials = pl.pallas_call(
        kernel,
        out_shape=jax.ShapeDtypeStruct((num_tiles, 8, 128), jnp.float32),
        grid_spec=pltpu.PrefetchScalarGridSpec(
            num_scalar_prefetch=0,
            grid=(num_tiles,),
            in_specs=in_specs,
            out_specs=pl.BlockSpec((1, 8, 128), lambda i: (i, 0, 0)),
        ),
        compiler_params=pltpu.CompilerParams(
            # Each tile writes its own partial-sum block -> batch axis is
            # embarrassingly parallel (lets v7x shard it across both TCs).
            dimension_semantics=("parallel",),
            vmem_limit_bytes=vmem_bytes,
        ),
    )(*flat_inputs)

    # Tiny final reduction + mean in the wrapper.
    return jnp.sum(partials[:, 0, 0]) / B


def reference_forward_f32(x, params, y):
    """Pure-f32 reference matching the PyTorch module semantics."""
    act = x
    for (w, b) in params:
        act = act @ w + b.reshape(1, -1)
    logp = jax.nn.log_softmax(act, axis=-1)
    nll = -jnp.take_along_axis(logp, y.reshape(-1, 1), axis=-1)[:, 0]
    return jnp.mean(nll)


def reference_forward_matched(x, params, y, compute_dtype=jnp.bfloat16):
    """Reference mirroring the kernel's bf16-into-MXU / f32-accumulate dtypes."""
    act = x
    for (w, b) in params:
        act = jnp.dot(act.astype(compute_dtype), w.astype(compute_dtype),
                      preferred_element_type=jnp.float32) + b.reshape(1, -1)
    logp = jax.nn.log_softmax(act, axis=-1)
    nll = -jnp.take_along_axis(logp, y.reshape(-1, 1), axis=-1)[:, 0]
    return jnp.mean(nll)


if __name__ == "__main__":
    # Small shapes consistent with the module (h_dim scaled down, n_layers=2).
    # Deliberately non-aligned so the padding/masking paths are exercised:
    # H=100 pads to 128 lanes; B=200 with block_b=128 -> 2 batch tiles, the
    # second of which carries 56 padded rows.
    B, H, n_layers = 200, 100, 2
    key = jax.random.PRNGKey(0)
    keys = jax.random.split(key, 2 + 2 * n_layers)

    x = jax.random.normal(keys[0], (B, H), dtype=jnp.float32)
    y = jax.random.randint(keys[1], (B,), 0, H, dtype=jnp.int32)

    bound = 1.0 / (H ** 0.5)  # nn.Linear default init range (deterministic here)
    params = []
    for l in range(n_layers):
        kw, kb = keys[2 + 2 * l], keys[3 + 2 * l]
        params.append((
            jax.random.uniform(kw, (H, H), jnp.float32, -bound, bound),
            jax.random.uniform(kb, (H,), jnp.float32, -bound, bound),
        ))

    loss = nn_model_loss(x, tuple(params), y, block_b=128)
    jax.block_until_ready(loss)

    ref_matched = reference_forward_matched(x, params, y)
    ref_f32 = reference_forward_f32(x, params, y)

    # Tight check against a dtype-matched reference, loose check against the
    # pure-f32 PyTorch-equivalent forward (bf16 MXU path introduces ~1e-3 err).
    assert jnp.allclose(loss, ref_matched, rtol=1e-4, atol=1e-4), (loss, ref_matched)
    assert jnp.allclose(loss, ref_f32, rtol=5e-2, atol=5e-2), (loss, ref_f32)

    print("KERNEL_OK")
</pallas_src>

<mosaic_0001>
module attributes {stable_mosaic.version = 11 : i64} {
  func.func @nn_ce_kernel(%arg0: i32, %arg1: memref<1x128xi32, #tpu.memory_space<vmem>>, %arg2: memref<128x128xbf16, #tpu.memory_space<vmem>>, %arg3: memref<128x128xbf16, #tpu.memory_space<vmem>>, %arg4: memref<1x128xf32, #tpu.memory_space<vmem>>, %arg5: memref<128x128xbf16, #tpu.memory_space<vmem>>, %arg6: memref<1x128xf32, #tpu.memory_space<vmem>>, %arg7: memref<128x1xi32, #tpu.memory_space<vmem>>, %arg8: memref<1x8x128xf32, #tpu.memory_space<vmem>>) attributes {dimension_semantics = [#tpu.dimension_semantics<parallel>], iteration_bounds = array<i64: 2>, scalar_prefetch = 0 : i64, scratch_operands = 0 : i64, tpu.core_type = #tpu.core_type<tc>, window_params = [{pipeline_mode = #tpu.pipeline_mode<synchronous>, transform_indices = @transform_0, window_bounds = array<i64: 1, 128>}, {transform_indices = @transform_1, window_bounds = array<i64: 128, 128>}, {pipeline_mode = #tpu.pipeline_mode<synchronous>, transform_indices = @transform_2, window_bounds = array<i64: 128, 128>}, {pipeline_mode = #tpu.pipeline_mode<synchronous>, transform_indices = @transform_3, window_bounds = array<i64: 1, 128>}, {pipeline_mode = #tpu.pipeline_mode<synchronous>, transform_indices = @transform_4, window_bounds = array<i64: 128, 128>}, {pipeline_mode = #tpu.pipeline_mode<synchronous>, transform_indices = @transform_5, window_bounds = array<i64: 1, 128>}, {transform_indices = @transform_6, window_bounds = array<i64: 128, 1>}, {transform_indices = @transform_7, window_bounds = array<i64: 1, 8, 128>}]} {
    %c0 = arith.constant 0 : index
    %c0_0 = arith.constant 0 : index
    %0 = vector.load %arg2[%c0, %c0_0] : memref<128x128xbf16, #tpu.memory_space<vmem>>, vector<128x128xbf16>
    %c0_1 = arith.constant 0 : index
    %c0_2 = arith.constant 0 : index
    %1 = vector.load %arg3[%c0_1, %c0_2] : memref<128x128xbf16, #tpu.memory_space<vmem>>, vector<128x128xbf16>
    %cst = arith.constant dense<0.000000e+00> : vector<128x128xf32>
    %2 = tpu.matmul %0, %1, %cst {dimension_numbers = #tpu.dot_dimension_numbers<[1], [0], [0], [1], [0, 0, 1, 1], [], []>} : vector<128x128xbf16>, vector<128x128xbf16>, vector<128x128xf32> -> vector<128x128xf32>
    %c0_3 = arith.constant 0 : index
    %c0_4 = arith.constant 0 : index
    %3 = vector.load %arg4[%c0_3, %c0_4] : memref<1x128xf32, #tpu.memory_space<vmem>>, vector<1x128xf32>
    %4 = vector.broadcast %3 : vector<1x128xf32> to vector<128x128xf32>
    %5 = arith.addf %2, %4 : vector<128x128xf32>
    %6 = arith.truncf %5 : vector<128x128xf32> to vector<128x128xbf16>
    %c0_5 = arith.constant 0 : index
    %c0_6 = arith.constant 0 : index
    %7 = vector.load %arg5[%c0_5, %c0_6] : memref<128x128xbf16, #tpu.memory_space<vmem>>, vector<128x128xbf16>
    %cst_7 = arith.constant dense<0.000000e+00> : vector<128x128xf32>
    %8 = tpu.matmul %6, %7, %cst_7 {dimension_numbers = #tpu.dot_dimension_numbers<[1], [0], [0], [1], [0, 0, 1, 1], [], []>} : vector<128x128xbf16>, vector<128x128xbf16>, vector<128x128xf32> -> vector<128x128xf32>
    %c0_8 = arith.constant 0 : index
    %c0_9 = arith.constant 0 : index
    %9 = vector.load %arg6[%c0_8, %c0_9] : memref<1x128xf32, #tpu.memory_space<vmem>>, vector<1x128xf32>
    %10 = vector.broadcast %9 : vector<1x128xf32> to vector<128x128xf32>
    %11 = arith.addf %8, %10 : vector<128x128xf32>
    %cst_10 = arith.constant dense<0xFF800000> : vector<128xf32>
    %12 = vector.multi_reduction <maximumf>, %11, %cst_10 [1] : vector<128x128xf32> to vector<128xf32>
    %13 = vector.shape_cast %12 : vector<128xf32> to vector<128x1xf32>
    %14 = vector.broadcast %13 : vector<128x1xf32> to vector<128x128xf32>
    %15 = arith.subf %11, %14 : vector<128x128xf32>
    %16 = math.exp %15 : vector<128x128xf32>
    %cst_11 = arith.constant dense<0.000000e+00> : vector<128xf32>
    %17 = vector.multi_reduction <add>, %16, %cst_11 [1] : vector<128x128xf32> to vector<128xf32>
    %18 = vector.shape_cast %17 : vector<128xf32> to vector<128x1xf32>
    %19 = math.log %18 : vector<128x1xf32>
    %c0_12 = arith.constant 0 : index
    %c0_13 = arith.constant 0 : index
    %20 = vector.load %arg1[%c0_12, %c0_13] : memref<1x128xi32, #tpu.memory_space<vmem>>, vector<1x128xi32>
    %c0_14 = arith.constant 0 : index
    %c0_15 = arith.constant 0 : index
    %21 = vector.load %arg7[%c0_14, %c0_15] : memref<128x1xi32, #tpu.memory_space<vmem>>, vector<128x1xi32>
    %22 = vector.broadcast %20 : vector<1x128xi32> to vector<128x128xi32>
    %23 = vector.broadcast %21 : vector<128x1xi32> to vector<128x128xi32>
    %24 = arith.cmpi eq, %22, %23 : vector<128x128xi32>
    %cst_16 = arith.constant 0.000000e+00 : f32
    %25 = vector.broadcast %cst_16 : f32 to vector<128x128xf32>
    %26 = arith.select %24, %11, %25 : vector<128x128xi1>, vector<128x128xf32>
    %cst_17 = arith.constant dense<0.000000e+00> : vector<128xf32>
    %27 = vector.multi_reduction <add>, %26, %cst_17 [1] : vector<128x128xf32> to vector<128xf32>
    %28 = vector.shape_cast %27 : vector<128xf32> to vector<128x1xf32>
    %29 = arith.addf %13, %19 : vector<128x1xf32>
    %30 = arith.subf %29, %28 : vector<128x1xf32>
    %31 = tpu.iota {dimensions = array<i32: 0>} : vector<128x1xi32>
    %c128_i32 = arith.constant 128 : i32
    %32 = arith.muli %arg0, %c128_i32 : i32
    %33 = vector.broadcast %32 : i32 to vector<128x1xi32>
    %34 = arith.addi %31, %33 : vector<128x1xi32>
    %c200_i32 = arith.constant 200 : i32
    %35 = vector.broadcast %c200_i32 : i32 to vector<128x1xi32>
    %36 = arith.cmpi slt, %34, %35 : vector<128x1xi32>
    %cst_18 = arith.constant 0.000000e+00 : f32
    %37 = vector.broadcast %cst_18 : f32 to vector<128x1xf32>
    %38 = arith.select %36, %30, %37 : vector<128x1xi1>, vector<128x1xf32>
    %39 = vector.shape_cast %38 : vector<128x1xf32> to vector<1x128x1xf32>
    %cst_19 = arith.constant dense<0.000000e+00> : vector<1xf32>
    %40 = vector.multi_reduction <add>, %39, %cst_19 [1, 2] : vector<1x128x1xf32> to vector<1xf32>
    %41 = vector.shape_cast %40 : vector<1xf32> to vector<1x1x1xf32>
    %42 = vector.extract %41[0, 0, 0] : f32 from vector<1x1x1xf32>
    %43 = vector.broadcast %42 : f32 to vector<1x8x128xf32>
    %c0_20 = arith.constant 0 : index
    %c0_21 = arith.constant 0 : index
    %c0_22 = arith.constant 0 : index
    %44 = vector.load %arg8[%c0_20, %c0_21, %c0_22] : memref<1x8x128xf32, #tpu.memory_space<vmem>>, vector<1x8x128xf32>
    tpu.vector_store %arg8[%c0_20, %c0_21, %c0_22], %43 {strides = array<i32>} : memref<1x8x128xf32, #tpu.memory_space<vmem>>, vector<1x8x128xf32>,
    return
  }
  func.func @transform_0(%arg0: i32) -> (i32, i32) {
    %c0_i32 = arith.constant 0 : i32
    %c0_i32_0 = arith.constant 0 : i32
    %c0_i32_1 = arith.constant 0 : i32
    return %c0_i32, %c0_i32_0 : i32, i32
  }
  func.func @transform_1(%arg0: i32) -> (i32, i32) {
    %c0_i32 = arith.constant 0 : i32
    %c0_i32_0 = arith.constant 0 : i32
    return %arg0, %c0_i32 : i32, i32
  }
  func.func @transform_2(%arg0: i32) -> (i32, i32) {
    %c0_i32 = arith.constant 0 : i32
    %c0_i32_0 = arith.constant 0 : i32
    %c0_i32_1 = arith.constant 0 : i32
    return %c0_i32, %c0_i32_0 : i32, i32
  }
  func.func @transform_3(%arg0: i32) -> (i32, i32) {
    %c0_i32 = arith.constant 0 : i32
    %c0_i32_0 = arith.constant 0 : i32
    %c0_i32_1 = arith.constant 0 : i32
    return %c0_i32, %c0_i32_0 : i32, i32
  }
  func.func @transform_4(%arg0: i32) -> (i32, i32) {
    %c0_i32 = arith.constant 0 : i32
    %c0_i32_0 = arith.constant 0 : i32
    %c0_i32_1 = arith.constant 0 : i32
    return %c0_i32, %c0_i32_0 : i32, i32
  }
  func.func @transform_5(%arg0: i32) -> (i32, i32) {
    %c0_i32 = arith.constant 0 : i32
    %c0_i32_0 = arith.constant 0 : i32
    %c0_i32_1 = arith.constant 0 : i32
    return %c0_i32, %c0_i32_0 : i32, i32
  }
  func.func @transform_6(%arg0: i32) -> (i32, i32) {
    %c0_i32 = arith.constant 0 : i32
    %c0_i32_0 = arith.constant 0 : i32
    return %arg0, %c0_i32 : i32, i32
  }
  func.func @transform_7(%arg0: i32) -> (i32, i32, i32) {
    %c0_i32 = arith.constant 0 : i32
    %c0_i32_0 = arith.constant 0 : i32
    %c0_i32_1 = arith.constant 0 : i32
    return %arg0, %c0_i32, %c0_i32_0 : i32, i32, i32
  }
}

</mosaic_0001>

<bundles_post_ra>
// kernel: nn_model_loss.1
= control target key start
LH: loop header
LB: loop body
LE: loop exit
PB: predicated region body
PF: predicated region fallthrough
CT: control target
= control target key end

     0   :  { %s1480_s24 = smov 0   ;;  %s1845_s0 = inlined_call_operand.vmem [shape: s32[1,128], index: 0, kind: input, shape index: {}]   ;;  %s1846_s1 = inlined_call_operand.vmem [shape: bf16[256,128], index: 1, kind: input, shape index: {}]   ;;  %s1847_s2 = inlined_call_operand.vmem [shape: bf16[128,128], index: 2, kind: input, shape index: {}]   ;;  %s1848_s3 = inlined_call_operand.vmem [shape: f32[1,128], index: 3, kind: input, shape index: {}]   ;;  %s1849_s4 = inlined_call_operand.vmem [shape: bf16[128,128], index: 4, kind: input, shape index: {}]   ;;  %s1850_s5 = inlined_call_operand.vmem [shape: f32[1,128], index: 5, kind: input, shape index: {}]   ;;  %s1851_s6 = inlined_call_operand.vmem [shape: s32[256,1], index: 6, kind: input, shape index: {}]   ;;  %s1852_s7 = inlined_call_operand.vmem [shape: f32[2,8,128], index: 7, kind: output, shape index: {}]  }
   0x1 LB: > { %s1486_s25 = sadd.s32 4294967295, %s1437_s24   ;;  %p1198_p0 = scmp.ge.s32.totalorder %s1437_s24, 1  ;;  %s1437_s24 = sphi %s1480_s24, %s17_s24  }
   0x2   : > { %p249_p1 = scmp.lt.s32.totalorder %s1437_s24, 3 }
   0x4   : > { %p250_p2 = pnand %p1198_p0, %p249_p1 }
   0x5   : > { %v1343_v0 = vld [vmem:[%s1847_s2] sm:$0xff] (!%p250_p2)   ;;  %s1199_s28 = sshll.u32 (!%p250_p2), %s1486_s25, 4  ;;  %v1344_v1 = vld [vmem:[%s1847_s2 + $0x8] sm:$0xff] (!%p250_p2)   ;;  %v1345_v2 = vld [vmem:[%s1847_s2 + $0x10] sm:$0xff] (!%p250_p2)   ;;  %v1439_v24 = vmov (!%p250_p2), 0   ;;  %s1231_s9 = sshll.u32 (!%p250_p2), %s1486_s25, 7 }
   0x6   : > { %253 = sbr.rel (%p250_p2) target bundleno = 1041 (0x411), region = 48  ;;  %p286_p3 = scmp.lt.s32.totalorder (!%p250_p2), %s1199_s28, 31  ;;  %1266 = vmatprep.subr.bf16.mxu0 (!%p250_p2), %v1343_v0  ;;  %v1346_v3 = vld [vmem:[%s1847_s2 + $0x18] sm:$0xff] (!%p250_p2)   ;;  %v1347_v5 = vld [vmem:[%s1847_s2 + $0x20] sm:$0xff] (!%p250_p2)   ;;  %v1348_v6 = vld [vmem:[%s1847_s2 + $0x28] sm:$0xff] (!%p250_p2)   ;;  %1342 = vset.pattern.permute.xlu1 (!%p250_p2), %v1439_v24 }
   0x7   : > { %1267 = vmatpush3.bf16.msra.mxu0 (!%p250_p2), %v1343_v0  ;;  %v1359_v7 = vld [vmem:[%s1849_s4] sm:$0xff] (!%p250_p2)   ;;  %v1360_v8 = vld [vmem:[%s1849_s4 + $0x8] sm:$0xff] (!%p250_p2)   ;;  %v1349_v9 = vld [vmem:[%s1847_s2 + $0x30] sm:$0xff] (!%p250_p2)   ;;  %1341 = vset.pattern.permute.xlu0 (!%p250_p2), %v1439_v24  ;;  %p297_p4 = scmp.lt.s32.totalorder (!%p250_p2), %s1486_s25, 1 }
   0x8   : > { %1268 = vmatprep.subr.bf16.mxu0 (!%p250_p2), %v1344_v1  ;;  %1298 = vmatprep.subr.bf16.mxu1 (!%p250_p2), %v1359_v7  ;;  %v1361_v10 = vld [vmem:[%s1849_s4 + $0x10] sm:$0xff] (!%p250_p2)   ;;  %v1350_v11 = vld [vmem:[%s1847_s2 + $0x38] sm:$0xff] (!%p250_p2)   ;;  %v1363_v13 = vld [vmem:[%s1849_s4 + $0x20] sm:$0xff] (!%p250_p2)  }
   0x9   : > { %1299 = vmatpush3.bf16.msra.mxu1 (!%p250_p2), %v1359_v7  ;;  %v1362_v12 = vld [vmem:[%s1849_s4 + $0x18] sm:$0xff] (!%p250_p2)   ;;  %v1364_v16 = vld [vmem:[%s1849_s4 + $0x28] sm:$0xff] (!%p250_p2)   ;;  %v1365_v22 = vld [vmem:[%s1849_s4 + $0x30] sm:$0xff] (!%p250_p2)  }
   0xa   : > { %1300 = vmatprep.subr.bf16.mxu1 (!%p250_p2), %v1360_v8  ;;  %v1366_v23 = vld [vmem:[%s1849_s4 + $0x38] sm:$0xff] (!%p250_p2)   ;;  %v1204_v40 = vld [vmem:[%s1848_s3] ss:$0 sm:$0xff] (!%p250_p2) }
   0xb   : > { %1269 = vmatpush3.bf16.msra.mxu0 (!%p250_p2), %v1344_v1 }
   0xc   : > { %1270 = vmatprep.subr.bf16.mxu0 (!%p250_p2), %v1345_v2 }
   0xd   : > { %s1854_s28 = smov (!%p286_p3, %s1199_s28), 31  ;;  %1301 = vmatpush3.bf16.msra.mxu1 %v1360_v8  ;;  %s1856_s25 = smov (!%p297_p4, %s1486_s25), 1 }
   0xe   : > { %s1200_s10 = sshll.u32 %s1854_s28, 2  ;;  %1302 = vmatprep.subr.bf16.mxu1 %v1361_v10  ;;  %s1202_s21 = sshll.u32 %s1854_s28, 3 }
   0xf   : > { %s1506_s13 = scalar_lea.vmem %s1846_s1, %s1200_s10  ;;  %1271 = vmatpush3.bf16.msra.mxu0 %v1345_v2  ;;  %s1203_s10 = sshll.u32 %s1856_s25, 3 }
  0x10   : > { %v1351_v4 = vld [vmem:[%s1506_s13] sm:$0xff]   ;;  %1272 = vmatprep.subr.bf16.mxu0 %v1346_v3  ;;  %v1352_v14 = vld [vmem:[%s1506_s13 + $0x8] sm:$0xff]   ;;  %v1353_v15 = vld [vmem:[%s1506_s13 + $0x10] sm:$0xff]   ;;  %s300_s14 = scalar_lea.vmem %s1852_s7, %s1203_s10 }
  0x11   : > { %1282 = vmatprep.mubr.bf16.mxu0 %v1351_v4  ;;  %1303 = vmatpush3.bf16.msra.mxu1 %v1361_v10  ;;  %v1354_v17 = vld [vmem:[%s1506_s13 + $0x18] sm:$0xff]   ;;  %v1355_v18 = vld [vmem:[%s1506_s13 + $0x20] sm:$0xff]   ;;  %v1356_v19 = vld [vmem:[%s1506_s13 + $0x28] sm:$0xff]  }
  0x12   : > { %1304 = vmatprep.subr.bf16.mxu1 %v1362_v12  ;;  %v1357_v20 = vld [vmem:[%s1506_s13 + $0x30] sm:$0xff]   ;;  %v1358_v21 = vld [vmem:[%s1506_s13 + $0x38] sm:$0xff]   ;;  %s1559_s13 = scalar_lea.vmem %s1851_s6, %s1202_s21 }
  0x13   : > { %1273 = vmatpush3.bf16.msra.mxu0 %v1346_v3  ;;  %v856_v25 = vld [vmem:[%s1559_s13 + $0x8] sm:$0xff]  ;;  %v855_v26 = vld [vmem:[%s1559_s13] sm:$0xff]  ;;  %v857_v27 = vld [vmem:[%s1559_s13 + $0x10] sm:$0xff] }
  0x14   : > { %1274 = vmatprep.subr.bf16.mxu0 %v1347_v5  ;;  %879 = vperm.xlu1 %1342, %v856_v25   ;;  %v864_v28 = vld [vmem:[%s1559_s13 + $0x48] sm:$0xff]  ;;  %v858_v29 = vld [vmem:[%s1559_s13 + $0x18] sm:$0xff]  ;;  %v859_v31 = vld [vmem:[%s1559_s13 + $0x20] sm:$0xff] }
  0x15   : > { %1305 = vmatpush3.bf16.msra.mxu1 %v1362_v12  ;;  %876 = vperm.xlu0 %1341, %v855_v26   ;;  %v866_v30 = vld [vmem:[%s1559_s13 + $0x58] sm:$0xff]  ;;  %v868_v32 = vld [vmem:[%s1559_s13 + $0x68] sm:$0xff]  ;;  %v861_v34 = vld [vmem:[%s1559_s13 + $0x30] sm:$0xff] }
  0x16   : > { %1306 = vmatprep.subr.bf16.mxu1 %v1363_v13  ;;  %v860_v33 = vld [vmem:[%s1559_s13 + $0x28] sm:$0xff]  ;;  %v862_v35 = vld [vmem:[%s1559_s13 + $0x38] sm:$0xff]  ;;  %v863_v36 = vld [vmem:[%s1559_s13 + $0x40] sm:$0xff] }
  0x17   : > { %1275 = vmatpush3.bf16.msra.mxu0 %v1347_v5  ;;  %v865_v37 = vld [vmem:[%s1559_s13 + $0x50] sm:$0xff]  ;;  %v867_v38 = vld [vmem:[%s1559_s13 + $0x60] sm:$0xff] }
  0x18   : > { %1276 = vmatprep.subr.bf16.mxu0 %v1348_v6  ;;  %882 = vperm.xlu1 %1342, %v857_v27  }
  0x19   : > { %1307 = vmatpush3.bf16.msra.mxu1 %v1363_v13  ;;  %903 = vperm.xlu0 %1341, %v864_v28  }
  0x1a   : > { %1308 = vmatprep.subr.bf16.mxu1 %v1364_v16 }
  0x1b   : > { %1277 = vmatpush3.bf16.msra.mxu0 %v1348_v6 }
  0x1c   : > { %1278 = vmatprep.subr.bf16.mxu0 %v1349_v9  ;;  %885 = vperm.xlu1 %1342, %v858_v29  }
  0x1d   : > { %1309 = vmatpush3.bf16.msra.mxu1 %v1364_v16  ;;  %909 = vperm.xlu0 %1341, %v866_v30   ;;  %v1221_v16 = vld [vmem:[%s1850_s5] ss:$0 sm:$0xff] }
  0x1e   : > { %1310 = vmatprep.subr.bf16.mxu1 %v1365_v22 }
  0x1f   : > { %1279 = vmatpush3.bf16.msra.mxu0 %v1349_v9 }
  0x20   : > { %1280 = vmatprep.subr.bf16.mxu0 %v1350_v11  ;;  %888 = vperm.xlu1 %1342, %v859_v31  }
  0x21   : > { %1311 = vmatpush3.bf16.msra.mxu1 %v1365_v22  ;;  %915 = vperm.xlu0 %1341, %v868_v32  }
  0x22   : > { %1312 = vmatprep.subr.bf16.mxu1 %v1366_v23 }
  0x23   : > { %1281 = vmatpush3.bf16.msra.mxu0 %v1350_v11 }
  0x24   : > { %891 = vperm.xlu1 %1342, %v860_v33  }
  0x25   : > { %1313 = vmatpush3.bf16.msra.mxu1 %v1366_v23 }
  0x26   : > { %1283 = vmatmul.mubr.bf16.vlgmr.msra.gmra.mrb[0].mxu0 %v1352_v14 }
  0x27   : > { %1286 = vmatprep.mubr.bf16.mxu0 %v1353_v15 }
  0x28   : > { %894 = vperm.xlu1 %1342, %v861_v34  }
  0x2c   : > { %897 = vperm.xlu1 %1342, %v862_v35  }
  0x2e   : > { %1287 = vmatmul.mubr.bf16.gmra.mrb[4].mxu0 %v1354_v17 }
  0x2f   : > { %1290 = vmatprep.mubr.bf16.mxu0 %v1355_v18 }
  0x30   : > { %900 = vperm.xlu1 %1342, %v863_v36  }
  0x34   : > { %906 = vperm.xlu1 %1342, %v865_v37  }
  0x36   : > { %1291 = vmatmul.mubr.bf16.gmra.mrb[8].mxu0 %v1356_v19 }
  0x37   : > { %1294 = vmatprep.mubr.bf16.mxu0 %v1357_v20 }
  0x38   : > { %912 = vperm.xlu1 %1342, %v867_v38  }
  0x3e   : > { %1295 = vmatmul.mubr.bf16.gmra.mrb[12].mxu0 %v1358_v21 }
  0xf9   : > { %v1284_v39 = vpop.f32.mrb[0].mxu0 }
  0xfa   : > { %v471_v41 = vpop.f32.mrb[1].mxu0  ;;  %v480_v43 = vadd.f32 %v1284_v39, %v1204_v40 }
  0xfb   : > { %v1285_v42 = vpop.f32.mrb[2].mxu0  ;;  %v472_v46 = vadd.f32 %v1204_v40, %v471_v41 }
  0xfc   : > { %v483_v44 = vadd.f32 %v1285_v42, %v1204_v40  ;;  %v474_v45 = vpop.f32.mrb[3].mxu0 }
  0xfd   : > { %v475_v47 = vadd.f32 %v1204_v40, %v474_v45 }
  0xfe   : > { %v535_v48 = vpack.c.bf16 %v483_v44, %v480_v43 }
  0xff   : > { %v534_v49 = vpack.c.bf16 %v475_v47, %v472_v46 }
 0x101   : > { %v1288_v50 = vpop.f32.mrb[4].mxu0  ;;  %1314 = vmatprep.mubr.bf16.mxu1 %v534_v49  ;;  %v869_v49 = vld [vmem:[%s1559_s13 + $0x70] sm:$0xff] }
 0x102   : > { %v487_v51 = vpop.f32.mrb[5].mxu0  ;;  %1315 = vmatmul.mubr.bf16.vlgmr.msra.gmra.mrb[0].mxu1 %v535_v48  ;;  %v496_v53 = vadd.f32 %v1288_v50, %v1204_v40  ;;  %v870_v50 = vld [vmem:[%s1559_s13 + $0x78] sm:$0xff] }
 0x103   : > { %v1289_v52 = vpop.f32.mrb[6].mxu0  ;;  %v488_v56 = vadd.f32 %v1204_v40, %v487_v51  ;;  %v880_v51 = vpop.permute.xlu1 %879 }
 0x104   : > { %v499_v54 = vadd.f32 %v1289_v52, %v1204_v40  ;;  %v490_v55 = vpop.f32.mrb[7].mxu0  ;;  %v1634_v52 = vld [vmem:[%s1845_s0] ss:$0 sm:$0xff] }
 0x105   : > { %v491_v57 = vadd.f32 %v1204_v40, %v490_v55  ;;  %vm924_vm0 = vcmp.eq.s32.totalorder %v1634_v52, %v880_v51 }
 0x106   : > { %v537_v58 = vpack.c.bf16 %v499_v54, %v496_v53  ;;  %v877_v53 = vpop.permute.xlu0 %876 }
 0x107   : > { %v536_v59 = vpack.c.bf16 %v491_v57, %v488_v56  ;;  %v883_v54 = vpop.permute.xlu1 %882  ;;  %vm923_vm1 = vcmp.eq.s32.totalorder %v1634_v52, %v877_v53 }
 0x108   : > { %vm925_vm2 = vcmp.eq.s32.totalorder %v1634_v52, %v883_v54 }
 0x109   : > { %v1292_v60 = vpop.f32.mrb[8].mxu0  ;;  %1318 = vmatprep.mubr.bf16.mxu1 %v536_v59 }
 0x10a   : > { %v512_v61 = vadd.f32 %v1292_v60, %v1204_v40  ;;  %v503_v62 = vpop.f32.mrb[9].mxu0  ;;  %1319 = vmatmul.mubr.bf16.gmra.mrb[4].mxu1 %v537_v58 }
 0x10b   : > { %v504_v63 = vadd.f32 %v1204_v40, %v503_v62  ;;  %v1293_v0 = vpop.f32.mrb[10].mxu0  ;;  %v886_v57 = vpop.permute.xlu1 %885 }
 0x10c   : > { %v515_v1 = vadd.f32 %v1293_v0, %v1204_v40  ;;  %v506_v2 = vpop.f32.mrb[11].mxu0  ;;  %vm926_vm3 = vcmp.eq.s32.totalorder %v1634_v52, %v886_v57 }
 0x10d   : > { %v507_v3 = vadd.f32 %v1204_v40, %v506_v2 }
 0x10e   : > { %v539_v4 = vpack.c.bf16 %v515_v1, %v512_v61  ;;  %v1654_v1 = vpop.permute.xlu0 %903 }
 0x10f   : > { %v538_v5 = vpack.c.bf16 %v507_v3, %v504_v63  ;;  %v1644_v60 = vpop.permute.xlu1 %888  ;;  %vm932_vm11 = vcmp.eq.s32.totalorder %v1634_v52, %v1654_v1 }
 0x110   : > { %vm927_vm4 = vcmp.eq.s32.totalorder %v1634_v52, %v1644_v60 }
 0x111   : > { %v1296_v6 = vpop.f32.mrb[12].mxu0  ;;  %1322 = vmatprep.mubr.bf16.mxu1 %v538_v5 }
 0x112   : > { %v528_v7 = vadd.f32 %v1296_v6, %v1204_v40  ;;  %v519_v8 = vpop.f32.mrb[13].mxu0  ;;  %1323 = vmatmul.mubr.bf16.gmra.mrb[8].mxu1 %v539_v4  ;;  %v1658_v3 = vpop.permute.xlu0 %909 }
 0x113   : > { %v520_v9 = vadd.f32 %v1204_v40, %v519_v8  ;;  %v1297_v10 = vpop.f32.mrb[14].mxu0  ;;  %v1646_v61 = vpop.permute.xlu1 %891  ;;  %vm934_vm13 = vcmp.eq.s32.totalorder %v1634_v52, %v1658_v3 }
 0x114   : > { %v531_v11 = vadd.f32 %v1297_v10, %v1204_v40  ;;  %v522_v12 = vpop.f32.mrb[15].mxu0  ;;  %vm928_vm5 = vcmp.eq.s32.totalorder %v1634_v52, %v1646_v61 }
 0x115   : > { %v523_v13 = vadd.f32 %v1204_v40, %v522_v12 }
 0x116   : > { %v541_v14 = vpack.c.bf16 %v531_v11, %v528_v7  ;;  %v1662_v5 = vpop.permute.xlu0 %915 }
 0x117   : > { %v540_v15 = vpack.c.bf16 %v523_v13, %v520_v9  ;;  %v1648_v62 = vpop.permute.xlu1 %894  ;;  %vm936_vm14 = vcmp.eq.s32.totalorder %v1634_v52, %v1662_v5  ;;  %v1019_v5 = vlaneseq }
 0x118   : > { %vm929_vm6 = vcmp.eq.s32.totalorder %v1634_v52, %v1648_v62 }
 0x119   : > { %1326 = vmatprep.mubr.bf16.mxu1 %v540_v15 }
 0x11a   : > { %1327 = vmatmul.mubr.bf16.gmra.mrb[12].mxu1 %v541_v14 }
 0x11b   : > { %v1650_v63 = vpop.permute.xlu1 %897 }
 0x11c   : > { %vm930_vm7 = vcmp.eq.s32.totalorder %v1634_v52, %v1650_v63 }
 0x11f   : > { %v1652_v0 = vpop.permute.xlu1 %900 }
 0x120   : > { %vm931_vm8 = vcmp.eq.s32.totalorder %v1634_v52, %v1652_v0 }
 0x123   : > { %v1656_v2 = vpop.permute.xlu1 %906 }
 0x124   : > { %vm933_vm9 = vcmp.eq.s32.totalorder %v1634_v52, %v1656_v2 }
 0x127   : > { %v1660_v4 = vpop.permute.xlu1 %912 }
 0x128   : > { %vm935_vm10 = vcmp.eq.s32.totalorder %v1634_v52, %v1660_v4 }
 0x1d5   : > { %v1316_v17 = vpop.f32.mrb[0].mxu1 }
 0x1d6   : > { %v1581_v18 = vadd.f32 %v1316_v17, %v1221_v16  ;;  %v647_v19 = vpop.f32.mrb[1].mxu1 }
 0x1d7   : > { %v1583_v20 = vadd.f32 %v1221_v16, %v647_v19  ;;  %v1317_v21 = vpop.f32.mrb[2].mxu1 }
 0x1d8   : > { %714 = vmax.xlane.f32.xlu1 %v1581_v18  ;;  %v650_v22 = vpop.f32.mrb[3].mxu1  ;;  %v1587_v23 = vadd.f32 %v1317_v21, %v1221_v16  ;;  %v941_v58 = vsel %vm925_vm2, %v1581_v18, 0.0 }
 0x1d9   : > { %710 = vmax.xlane.f32.xlu0 %v1583_v20  ;;  %v1589_v24 = vadd.f32 %v1221_v16, %v650_v22  ;;  %v939_v56 = vsel %vm923_vm1, %v1583_v20, 0.0 }
 0x1da   : > { %v942_v59 = vsel %vm926_vm3, %v1587_v23, 0.0  ;;  %vm1086_vm3 = vcmask 7168  }
 0x1db   : > { %v940_v55 = vsel %vm924_vm0, %v1589_v24, 0.0 }
 0x1dc   : > { %716 = vmax.xlane.f32.xlu1 %v1587_v23 }
 0x1dd   : > { %v1320_v25 = vpop.f32.mrb[4].mxu1  ;;  %712 = vmax.xlane.f32.xlu0 %v1589_v24 }
 0x1de   : > { %v1593_v26 = vadd.f32 %v1320_v25, %v1221_v16  ;;  %v663_v27 = vpop.f32.mrb[5].mxu1 }
 0x1df   : > { %v1321_v28 = vpop.f32.mrb[6].mxu1  ;;  %v1599_v31 = vadd.f32 %v1221_v16, %v663_v27 }
 0x1e0   : > { %v1595_v29 = vadd.f32 %v1321_v28, %v1221_v16  ;;  %v666_v30 = vpop.f32.mrb[7].mxu1 }
 0x1e1   : > { %722 = vmax.xlane.f32.xlu0 %v1593_v26  ;;  %v1601_v32 = vadd.f32 %v1221_v16, %v666_v30 }
 0x1e2   : > { %724 = vmax.xlane.f32.xlu1 %v1595_v29 }
 0x1e5   : > { %v1324_v33 = vpop.f32.mrb[8].mxu1  ;;  %718 = vmax.xlane.f32.xlu0 %v1599_v31 }
 0x1e6   : > { %v1604_v34 = vadd.f32 %v1324_v33, %v1221_v16  ;;  %v679_v35 = vpop.f32.mrb[9].mxu1  ;;  %720 = vmax.xlane.f32.xlu1 %v1601_v32 }
 0x1e7   : > { %v1325_v36 = vpop.f32.mrb[10].mxu1  ;;  %v1611_v39 = vadd.f32 %v1221_v16, %v679_v35 }
 0x1e8   : > { %v1607_v37 = vadd.f32 %v1325_v36, %v1221_v16  ;;  %v682_v38 = vpop.f32.mrb[11].mxu1 }
 0x1e9   : > { %730 = vmax.xlane.f32.xlu0 %v1604_v34  ;;  %v1613_v40 = vadd.f32 %v1221_v16, %v682_v38  ;;  %v947_v62 = vsel %vm931_vm8, %v1611_v39, 0.0 }
 0x1ea   : > { %732 = vmax.xlane.f32.xlu1 %v1607_v37  ;;  %v950_v2 = vsel %vm934_vm13, %v1607_v37, 0.0 }
 0x1eb   : > { %v948_v0 = vsel %vm932_vm11, %v1613_v40, 0.0 }
 0x1ed   : > { %v1328_v41 = vpop.f32.mrb[12].mxu1  ;;  %726 = vmax.xlane.f32.xlu0 %v1611_v39 }
 0x1ee   : > { %v1616_v42 = vadd.f32 %v1328_v41, %v1221_v16  ;;  %v695_v43 = vpop.f32.mrb[13].mxu1  ;;  %728 = vmax.xlane.f32.xlu1 %v1613_v40 }
 0x1ef   : > { %v1329_v44 = vpop.f32.mrb[14].mxu1  ;;  %v1623_v47 = vadd.f32 %v1221_v16, %v695_v43 }
 0x1f0   : > { %v1619_v45 = vadd.f32 %v1329_v44, %v1221_v16  ;;  %v698_v46 = vpop.f32.mrb[15].mxu1 }
 0x1f1   : > { %738 = vmax.xlane.f32.xlu0 %v1616_v42  ;;  %v1625_v48 = vadd.f32 %v1221_v16, %v698_v46 }
 0x1f2   : > { %740 = vmax.xlane.f32.xlu1 %v1619_v45 }
 0x1f5   : > { %734 = vmax.xlane.f32.xlu0 %v1623_v47 }
 0x1f6   : > { %736 = vmax.xlane.f32.xlu1 %v1625_v48 }
 0x207   : > { %918 = vperm.xlu1 %1342, %v869_v49  }
 0x20b   : > { %921 = vperm.xlu0 %1341, %v870_v50  }
 0x22a   : > { %957 = vadd.xlane.f32.xlu0 %v940_v55 }
 0x22b   : > { %955 = vadd.xlane.f32.xlu1 %v939_v56 }
 0x22e   : > { %959 = vadd.xlane.f32.xlu0 %v941_v58 }
 0x232   : > { %961 = vadd.xlane.f32.xlu0 %v942_v59 }
 0x265   : > { %v1664_v6 = vpop.xlane.xlu1 %714 }
 0x266   : > { %v744_v7 = vsub.f32 %v1581_v18, %v1664_v6  ;;  %v1668_v8 = vpop.xlane.xlu0 %710 }
 0x267   : > { %v742_v9 = vsub.f32 %v1583_v20, %v1668_v8 }
 0x268   : > { %v762_v10 = vmul.f32 1.442695, %v744_v7 }
 0x269   : > { %v758_v11 = vmul.f32 1.442695, %v742_v9  ;;  %v1672_v12 = vpop.xlane.xlu1 %716 }
 0x26a   : > { %1367 = vpow2.f32 %v762_v10  ;;  %v745_v13 = vsub.f32 %v1587_v23, %v1672_v12  ;;  %v1676_v14 = vpop.xlane.xlu0 %712 }
 0x26b   : > { %1369 = vpow2.f32 %v758_v11  ;;  %v743_v15 = vsub.f32 %v1589_v24, %v1676_v14 }
 0x26c   : > { %v764_v16 = vmul.f32 1.442695, %v745_v13 }
 0x26d   : > { %v760_v17 = vmul.f32 1.442695, %v743_v15 }
 0x26e   : > { %1371 = vpow2.f32 %v764_v16  ;;  %v1680_v18 = vpop.xlane.xlu0 %722 }
 0x26f   : > { %1373 = vpow2.f32 %v760_v17  ;;  %v748_v19 = vsub.f32 %v1593_v26, %v1680_v18  ;;  %v1684_v20 = vpop.xlane.xlu1 %724 }
 0x270   : > { %v749_v21 = vsub.f32 %v1595_v29, %v1684_v20 }
 0x271   : > { %v770_v22 = vmul.f32 1.442695, %v748_v19 }
 0x272   : > { %v772_v23 = vmul.f32 1.442695, %v749_v21  ;;  %v1688_v25 = vpop.xlane.xlu0 %718 }
 0x273   : > { %1375 = vpow2.f32 %v770_v22  ;;  %v746_v24 = vsub.f32 %v1599_v31, %v1688_v25  ;;  %v1692_v27 = vpop.xlane.xlu1 %720 }
 0x274   : > { %v1368_v28 = vpop.eup %1367  ;;  %1377 = vpow2.f32 %v772_v23  ;;  %v747_v30 = vsub.f32 %v1601_v32, %v1692_v27  ;;  %v943_v23 = vsel %vm927_vm4, %v1599_v31, 0.0  ;;  %v944_v31 = vsel %vm928_vm5, %v1601_v32, 0.0 }
 0x275   : > { %v1370_v33 = vpop.eup %1369  ;;  %v766_v35 = vmul.f32 1.442695, %v746_v24  ;;  %794 = vadd.xlane.f32.xlu0 %v1368_v28 }
 0x276   : > { %v768_v36 = vmul.f32 1.442695, %v747_v30  ;;  %v1696_v38 = vpop.xlane.xlu0 %730  ;;  %790 = vadd.xlane.f32.xlu1 %v1370_v33 }
 0x277   : > { %1379 = vpow2.f32 %v766_v35  ;;  %v752_v41 = vsub.f32 %v1604_v34, %v1696_v38  ;;  %v1700_v43 = vpop.xlane.xlu1 %732 }
 0x278   : > { %v1372_v44 = vpop.eup %1371  ;;  %1381 = vpow2.f32 %v768_v36  ;;  %v753_v46 = vsub.f32 %v1607_v37, %v1700_v43 }
 0x279   : > { %v1374_v49 = vpop.eup %1373  ;;  %v778_v50 = vmul.f32 1.442695, %v752_v41 }
 0x27a   : > { %792 = vadd.xlane.f32.xlu0 %v1374_v49  ;;  %v1704_v51 = vpop.xlane.xlu0 %726  ;;  %796 = vadd.xlane.f32.xlu1 %v1372_v44  ;;  %v780_v55 = vmul.f32 1.442695, %v753_v46  ;;  %v945_v44 = vsel %vm929_vm6, %v1593_v26, 0.0  ;;  %v946_v46 = vsel %vm930_vm7, %v1595_v29, 0.0  ;;  %v949_v26 = vsel %vm933_vm9, %v1604_v34, 0.0 }
 0x27b   : > { %1383 = vpow2.f32 %v778_v50  ;;  %v750_v53 = vsub.f32 %v1611_v39, %v1704_v51  ;;  %v1708_v54 = vpop.xlane.xlu1 %728  ;;  %v951_v39 = vsel %vm935_vm10, %v1623_v47, 0.0 }
 0x27c   : > { %v751_v56 = vsub.f32 %v1613_v40, %v1708_v54 }
 0x27d   : > { %v1376_v57 = vpop.eup %1375  ;;  %v774_v58 = vmul.f32 1.442695, %v750_v53 }
 0x27e   : > { %v1378_v59 = vpop.eup %1377  ;;  %802 = vadd.xlane.f32.xlu0 %v1376_v57  ;;  %v1712_v7 = vpop.xlane.xlu0 %738  ;;  %v776_v10 = vmul.f32 1.442695, %v751_v56 }
 0x27f   : > { %1385 = vpow2.f32 %v774_v58  ;;  %v1714_v9 = vpop.xlane.xlu1 %740  ;;  %804 = vadd.xlane.f32.xlu1 %v1378_v59  ;;  %v756_v11 = vsub.f32 %v1616_v42, %v1712_v7  ;;  %v1768_v59 = vstv %s1231_s9 }
 0x280   : > { %1387 = vpow2.f32 %v780_v55  ;;  %v757_v33 = vsub.f32 %v1619_v45, %v1714_v9 }
 0x281   : > { %v1380_v13 = vpop.eup %1379  ;;  %1389 = vpow2.f32 %v776_v10  ;;  %v786_v17 = vmul.f32 1.442695, %v756_v11 }
 0x282   : > { %v1382_v15 = vpop.eup %1381  ;;  %798 = vadd.xlane.f32.xlu0 %v1380_v13  ;;  %v1720_v16 = vpop.xlane.xlu0 %734  ;;  %v788_v41 = vmul.f32 1.442695, %v757_v33 }
 0x283   : > { %800 = vadd.xlane.f32.xlu1 %v1382_v15  ;;  %v754_v19 = vsub.f32 %v1623_v47, %v1720_v16  ;;  %v1724_v22 = vpop.xlane.xlu1 %736  ;;  %1391 = vpow2.f32 %v786_v17  ;;  %v952_v47 = vsel %vm936_vm14, %v1625_v48, 0.0 }
 0x284   : > { %v755_v60 = vsub.f32 %v1625_v48, %v1724_v22  ;;  %v1764_v48 = vshrl.u32 %v1019_v5, 7 }
 0x285   : > { %v1384_v21 = vpop.eup %1383  ;;  %v782_v24 = vmul.f32 1.442695, %v754_v19 }
 0x286   : > { %963 = vadd.xlane.f32.xlu0 %v943_v23  ;;  %v784_v35 = vmul.f32 1.442695, %v755_v60  ;;  %v1022_v58 = vadd.s32 16, %v1764_v48  ;;  %v1021_v13 = vadd.s32 8, %v1764_v48  ;;  %v1038_v19 = vadd.s32 %v1768_v59, %v1764_v48 }
 0x287   : > { %810 = vadd.xlane.f32.xlu1 %v1384_v21  ;;  %1393 = vpow2.f32 %v782_v24  ;;  %v919_v29 = vpop.permute.xlu1 %918  ;;  %v1023_v33 = vadd.s32 24, %v1764_v48  ;;  %v1026_v5 = vadd.s32 48, %v1764_v48 }
 0x288   : > { %1395 = vpow2.f32 %v784_v35  ;;  %vm937_vm12 = vcmp.eq.s32.totalorder %v1634_v52, %v919_v29  ;;  %v1040_v23 = vadd.s32 %v1768_v59, %v1022_v58  ;;  %vm1054_vm0 = vcmp.lt.s32.totalorder %v1038_v19, 200 }
 0x289   : > { %v1386_v28 = vpop.eup %1385  ;;  %1397 = vpow2.f32 %v788_v41  ;;  %v953_v34 = vsel %vm937_vm12, %v1616_v42, 0.0  ;;  %v1025_v29 = vadd.s32 40, %v1764_v48 }
 0x28a   : > { %v1388_v30 = vpop.eup %1387  ;;  %806 = vadd.xlane.f32.xlu0 %v1386_v28  ;;  %v922_v1 = vpop.permute.xlu0 %921  ;;  %vm1056_vm1 = vcmp.lt.s32.totalorder %v1040_v23, 200 }
 0x28b   : > { %812 = vadd.xlane.f32.xlu1 %v1388_v30  ;;  %v1390_v36 = vpop.eup %1389  ;;  %vm938_vm15 = vcmp.eq.s32.totalorder %v1634_v52, %v922_v1  ;;  %v1039_v30 = vadd.s32 %v1768_v59, %v1021_v13 }
 0x28c   : > { %v954_v40 = vsel %vm938_vm15, %v1619_v45, 0.0 }
 0x28d   : > { %v1392_v61 = vpop.eup %1391  ;;  %vm1055_vm2 = vcmp.lt.s32.totalorder %v1039_v30, 200 }
 0x28e   : > { %965 = vadd.xlane.f32.xlu0 %v944_v31 }
 0x28f   : > { %808 = vadd.xlane.f32.xlu1 %v1390_v36 }
 0x291   : > { %v1394_v32 = vpop.eup %1393 }
 0x292   : > { %967 = vadd.xlane.f32.xlu0 %v945_v44  ;;  %v1396_v49 = vpop.eup %1395 }
 0x293   : > { %818 = vadd.xlane.f32.xlu1 %v1392_v61  ;;  %v1398_v63 = vpop.eup %1397 }
 0x296   : > { %969 = vadd.xlane.f32.xlu0 %v946_v46 }
 0x297   : > { %814 = vadd.xlane.f32.xlu1 %v1394_v32  ;;  %v1024_v32 = vadd.s32 32, %v1764_v48 }
 0x29a   : > { %971 = vadd.xlane.f32.xlu0 %v947_v62  ;;  %v1041_v62 = vadd.s32 %v1768_v59, %v1023_v33 }
 0x29b   : > { %816 = vadd.xlane.f32.xlu1 %v1396_v49 }
 0x29c   : > { %vm1057_vm4 = vcmp.lt.s32.totalorder %v1041_v62, 200 }
 0x29e   : > { %975 = vadd.xlane.f32.xlu0 %v949_v26 }
 0x29f   : > { %820 = vadd.xlane.f32.xlu1 %v1398_v63 }
 0x2a2   : > { %979 = vadd.xlane.f32.xlu0 %v951_v39 }
 0x2a3   : > { %973 = vadd.xlane.f32.xlu1 %v948_v0 }
 0x2a6   : > { %983 = vadd.xlane.f32.xlu0 %v953_v34 }
 0x2a7   : > { %977 = vadd.xlane.f32.xlu1 %v950_v2 }
 0x2ab   : > { %981 = vadd.xlane.f32.xlu1 %v952_v47 }
 0x2af   : > { %985 = vadd.xlane.f32.xlu1 %v954_v40  ;;  %v1042_v40 = vadd.s32 %v1768_v59, %v1024_v32 }
 0x2b1   : > { %vm1058_vm5 = vcmp.lt.s32.totalorder %v1042_v40, 200  ;;  %v1031_v40 = vadd.s32 88, %v1764_v48 }
 0x2b7   : > { %v958_v3 = vpop.xlane.xlu0 %957 }
 0x2b8   : > { %v956_v50 = vpop.xlane.xlu1 %955 }
 0x2bb   : > { %v960_v4 = vpop.xlane.xlu0 %959 }
 0x2bf   : > { %v1762_v42 = vpop.xlane.xlu0 %961 }
 0x302   : > { %v795_v37 = vpop.xlane.xlu0 %794 }
 0x303   : > { %1399 = vlog2.f32 %v795_v37  ;;  %v791_v53 = vpop.xlane.xlu1 %790  ;;  %v1043_v37 = vadd.s32 %v1768_v59, %v1025_v29 }
 0x304   : > { %1401 = vlog2.f32 %v791_v53 }
 0x305   : > { %vm1059_vm6 = vcmp.lt.s32.totalorder %v1043_v37, 200 }
 0x307   : > { %v793_v55 = vpop.xlane.xlu0 %792  ;;  %v797_v56 = vpop.xlane.xlu1 %796 }
 0x308   : > { %1403 = vlog2.f32 %v793_v55 }
 0x309   : > { %1405 = vlog2.f32 %v797_v56 }
 0x30b   : > { %v803_v45 = vpop.xlane.xlu0 %802 }
 0x30c   : > { %v805_v52 = vpop.xlane.xlu1 %804  ;;  %1407 = vlog2.f32 %v803_v45 }
 0x30d   : > { %v1400_v57 = vpop.eup %1399 }
 0x30e   : > { %v1402_v10 = vpop.eup %1401  ;;  %v827_v11 = vmul.f32 0.6931472, %v1400_v57 }
 0x30f   : > { %v823_v15 = vmul.f32 0.6931472, %v1402_v10  ;;  %v799_v17 = vpop.xlane.xlu0 %798 }
 0x310   : > { %1409 = vlog2.f32 %v799_v17  ;;  %v801_v21 = vpop.xlane.xlu1 %800  ;;  %v989_v24 = vadd.f32 %v827_v11, %v1664_v6 }
 0x311   : > { %v987_v60 = vadd.f32 %v823_v15, %v1668_v8  ;;  %1411 = vlog2.f32 %v801_v21 }
 0x312   : > { %v1404_v28 = vpop.eup %1403  ;;  %1413 = vlog2.f32 %v805_v52  ;;  %v1005_v46 = vsub.f32 %v989_v24, %v960_v4  ;;  %v1027_v52 = vadd.s32 56, %v1764_v48  ;;  %v1044_v24 = vadd.s32 %v1768_v59, %v1026_v5 }
 0x313   : > { %v1406_v35 = vpop.eup %1405  ;;  %v1003_v31 = vsub.f32 %v987_v60, %v956_v50  ;;  %v825_v36 = vmul.f32 0.6931472, %v1404_v28  ;;  %v964_v41 = vpop.xlane.xlu0 %963 }
 0x314   : > { %v829_v44 = vmul.f32 0.6931472, %v1406_v35  ;;  %v811_v61 = vpop.xlane.xlu1 %810  ;;  %v1072_v34 = vsel %vm1056_vm1, %v1005_v46, 0.0  ;;  %v1045_v33 = vadd.s32 %v1768_v59, %v1027_v52  ;;  %vm1060_vm7 = vcmp.lt.s32.totalorder %v1044_v24, 200 }
 0x315   : > { %v988_v6 = vadd.f32 %v825_v36, %v1676_v14  ;;  %v1070_v49 = vsel %vm1054_vm0, %v1003_v31, 0.0  ;;  %v1028_v36 = vadd.s32 64, %v1764_v48  ;;  %v1034_v52 = vadd.s32 112, %v1764_v48 }
 0x316   : > { %v990_v8 = vadd.f32 %v829_v44, %v1672_v12  ;;  %v1408_v0 = vpop.eup %1407  ;;  %v1087_v12 = vsel %vm1086_vm3, %v1070_v49, 0.0  ;;  %vm1061_vm8 = vcmp.lt.s32.totalorder %v1045_v33, 200 }
 0x317   : > { %v1004_v26 = vsub.f32 %v988_v6, %v958_v3  ;;  %v807_v63 = vpop.xlane.xlu0 %806  ;;  %v835_v57 = vmul.f32 0.6931472, %v1408_v0 }
 0x318   : > { %1415 = vlog2.f32 %v807_v63  ;;  %v813_v39 = vpop.xlane.xlu1 %812  ;;  %v1006_v14 = vsub.f32 %v990_v8, %v1762_v42  ;;  %v1090_v42 = vsel %vm1086_vm3, %v1072_v34, 0.0 }
 0x319   : > { %v1071_v2 = vsel %vm1055_vm2, %v1004_v26, 0.0  ;;  %1417 = vlog2.f32 %v811_v61  ;;  %v1046_v26 = vadd.s32 %v1768_v59, %v1028_v36 }
 0x31a   : > { %v1410_v1 = vpop.eup %1409  ;;  %v1088_v47 = vsel %vm1086_vm3, %v1071_v2, 0.0  ;;  %v1073_v10 = vsel %vm1057_vm4, %v1006_v14, 0.0  ;;  %v1029_v2 = vadd.s32 72, %v1764_v48 }
 0x31b   : > { %v1412_v4 = vpop.eup %1411  ;;  %v831_v3 = vmul.f32 0.6931472, %v1410_v1  ;;  %v1089_v50 = vadd.f32 %v1088_v47, %v1087_v12  ;;  %v966_v53 = vpop.xlane.xlu0 %965  ;;  %v1092_v21 = vsel %vm1086_vm3, %v1073_v10, 0.0  ;;  %vm1062_vm9 = vcmp.lt.s32.totalorder %v1046_v26, 200 }
 0x31c   : > { %v1414_v55 = vpop.eup %1413  ;;  %v833_v56 = vmul.f32 0.6931472, %v1412_v4  ;;  %v809_v45 = vpop.xlane.xlu1 %808  ;;  %v1049_v10 = vadd.s32 %v1768_v59, %v1031_v40 }
 0x31d   : > { %v991_v58 = vadd.f32 %v831_v3, %v1688_v25  ;;  %v1091_v11 = vadd.f32 %v1090_v42, %v1089_v50  ;;  %1419 = vlog2.f32 %v809_v45  ;;  %v837_v15 = vmul.f32 0.6931472, %v1414_v55 }
 0x31e   : > { %v992_v13 = vadd.f32 %v833_v56, %v1692_v27  ;;  %v993_v25 = vadd.f32 %v835_v57, %v1680_v18  ;;  %1421 = vlog2.f32 %v813_v39  ;;  %v1047_v56 = vadd.s32 %v1768_v59, %v1029_v2 }
 0x31f   : > { %v1007_v17 = vsub.f32 %v991_v58, %v964_v41  ;;  %v968_v19 = vpop.xlane.xlu0 %967  ;;  %v1093_v30 = vadd.f32 %v1092_v21, %v1091_v11  ;;  %v994_v6 = vadd.f32 %v837_v15, %v1684_v20  ;;  %v1030_v20 = vadd.s32 80, %v1764_v48 }
 0x320   : > { %v1008_v23 = vsub.f32 %v992_v13, %v966_v53  ;;  %v819_v60 = vpop.xlane.xlu1 %818  ;;  %v1009_v61 = vsub.f32 %v993_v25, %v968_v19  ;;  %v1033_v11 = vadd.s32 104, %v1764_v48  ;;  %vm1063_vm11 = vcmp.lt.s32.totalorder %v1047_v56, 200 }
 0x321   : > { %v1074_v28 = vsel %vm1058_vm5, %v1007_v17, 0.0  ;;  %1423 = vlog2.f32 %v819_v60  ;;  %v1048_v5 = vadd.s32 %v1768_v59, %v1030_v20  ;;  %v1052_v25 = vadd.s32 %v1768_v59, %v1034_v52 }
 0x322   : > { %v1416_v35 = vpop.eup %1415  ;;  %v1094_v27 = vsel %vm1086_vm3, %v1074_v28, 0.0  ;;  %v1075_v31 = vsel %vm1059_vm6, %v1008_v23, 0.0  ;;  %v1076_v29 = vsel %vm1060_vm7, %v1009_v61, 0.0  ;;  %vm1065_vm13 = vcmp.lt.s32.totalorder %v1049_v10, 200 }
 0x323   : > { %v1095_v41 = vadd.f32 %v1094_v27, %v1093_v30  ;;  %v839_v44 = vmul.f32 0.6931472, %v1416_v35  ;;  %v970_v46 = vpop.xlane.xlu0 %969  ;;  %v1096_v8 = vsel %vm1086_vm3, %v1075_v31, 0.0  ;;  %v1418_v49 = vpop.eup %1417  ;;  %v1098_v47 = vsel %vm1086_vm3, %v1076_v29, 0.0 }
 0x324   : > { %v815_v18 = vpop.xlane.xlu1 %814  ;;  %v1010_v32 = vsub.f32 %v994_v6, %v970_v46  ;;  %v843_v14 = vmul.f32 0.6931472, %v1418_v49  ;;  %vm1064_vm10 = vcmp.lt.s32.totalorder %v1048_v5, 200  ;;  %v1051_v35 = vadd.s32 %v1768_v59, %v1033_v11 }
 0x325   : > { %1425 = vlog2.f32 %v815_v18  ;;  %v995_v62 = vadd.f32 %v839_v44, %v1704_v51  ;;  %v1097_v63 = vadd.f32 %v1096_v8, %v1095_v41  ;;  %v1032_v51 = vadd.s32 96, %v1764_v48 }
 0x326   : > { %v1077_v1 = vsel %vm1061_vm8, %v1010_v32, 0.0  ;;  %v997_v45 = vadd.f32 %v843_v14, %v1696_v38  ;;  %v1035_v18 = vadd.s32 120, %v1764_v48  ;;  %vm1068_vm14 = vcmp.lt.s32.totalorder %v1052_v25, 200 }
 0x327   : > { %v972_v39 = vpop.xlane.xlu0 %971  ;;  %v1420_v0 = vpop.eup %1419  ;;  %v1099_v3 = vadd.f32 %v1098_v47, %v1097_v63  ;;  %v1100_v53 = vsel %vm1086_vm3, %v1077_v1, 0.0  ;;  %v1050_v58 = vadd.s32 %v1768_v59, %v1032_v51  ;;  %vm1067_vm15 = vcmp.lt.s32.totalorder %v1051_v35, 200 }
 0x328   : > { %v817_v34 = vpop.xlane.xlu1 %816  ;;  %v1011_v12 = vsub.f32 %v995_v62, %v972_v39  ;;  %v841_v4 = vmul.f32 0.6931472, %v1420_v0  ;;  %v1422_v37 = vpop.eup %1421 }
 0x329   : > { %1427 = vlog2.f32 %v817_v34  ;;  %v845_v15 = vmul.f32 0.6931472, %v1422_v37  ;;  %v1101_v17 = vadd.f32 %v1100_v53, %v1099_v3  ;;  %vm1066_vm12 = vcmp.lt.s32.totalorder %v1050_v58, 200 }
 0x32a   : > { %v1078_v42 = vsel %vm1062_vm9, %v1011_v12, 0.0  ;;  %v996_v23 = vadd.f32 %v841_v4, %v1708_v54 }
 0x32b   : > { %v976_v50 = vpop.xlane.xlu0 %975  ;;  %v1424_v57 = vpop.eup %1423  ;;  %v1102_v38 = vsel %vm1086_vm3, %v1078_v42, 0.0  ;;  %v998_v41 = vadd.f32 %v845_v15, %v1700_v43 }
 0x32c   : > { %v821_v55 = vpop.xlane.xlu1 %820  ;;  %v1013_v19 = vsub.f32 %v997_v45, %v976_v50  ;;  %v851_v28 = vmul.f32 0.6931472, %v1424_v57  ;;  %v1103_v31 = vadd.f32 %v1102_v38, %v1101_v17 }
 0x32d   : > { %1429 = vlog2.f32 %v821_v55 }
 0x32e   : > { %v1080_v36 = vsel %vm1064_vm10, %v1013_v19, 0.0 }
 0x32f   : > { %v1426_v13 = vpop.eup %1425  ;;  %v980_v21 = vpop.xlane.xlu0 %979  ;;  %v1106_v49 = vsel %vm1086_vm3, %v1080_v36, 0.0 }
 0x330   : > { %v847_v24 = vmul.f32 0.6931472, %v1426_v13  ;;  %v974_v60 = vpop.xlane.xlu1 %973 }
 0x331   : > { %v1012_v30 = vsub.f32 %v996_v23, %v974_v60 }
 0x332   : > { %v999_v33 = vadd.f32 %v847_v24, %v1720_v16  ;;  %v1001_v16 = vadd.f32 %v851_v28, %v1712_v7  ;;  %v1053_v7 = vadd.s32 %v1768_v59, %v1035_v18 }
 0x333   : > { %v1428_v27 = vpop.eup %1427  ;;  %v1079_v54 = vsel %vm1063_vm11, %v1012_v30, 0.0  ;;  %v984_v6 = vpop.xlane.xlu0 %983 }
 0x334   : > { %v849_v44 = vmul.f32 0.6931472, %v1428_v27  ;;  %v1015_v61 = vsub.f32 %v999_v33, %v980_v21  ;;  %v1104_v46 = vsel %vm1086_vm3, %v1079_v54, 0.0  ;;  %v978_v8 = vpop.xlane.xlu1 %977  ;;  %v1017_v29 = vsub.f32 %v1001_v16, %v984_v6 }
 0x335   : > { %v1105_v32 = vadd.f32 %v1104_v46, %v1103_v31  ;;  %v1014_v62 = vsub.f32 %v998_v41, %v978_v8  ;;  %vm1069_vm0 = vcmp.lt.s32.totalorder %v1053_v7, 200 }
 0x336   : > { %v1000_v26 = vadd.f32 %v849_v44, %v1724_v22  ;;  %v1082_v43 = vsel %vm1066_vm12, %v1015_v61, 0.0  ;;  %v1084_v12 = vsel %vm1068_vm14, %v1017_v29, 0.0 }
 0x337   : > { %v1430_v63 = vpop.eup %1429  ;;  %v1107_v39 = vadd.f32 %v1106_v49, %v1105_v32  ;;  %v1081_v0 = vsel %vm1065_vm13, %v1014_v62, 0.0  ;;  %v1110_v1 = vsel %vm1086_vm3, %v1082_v43, 0.0  ;;  %v1114_v59 = vsel %vm1086_vm3, %v1084_v12, 0.0 }
 0x338   : > { %v853_v34 = vmul.f32 0.6931472, %v1430_v63  ;;  %v1108_v20 = vsel %vm1086_vm3, %v1081_v0, 0.0  ;;  %v982_v48 = vpop.xlane.xlu1 %981 }
 0x339   : > { %v1109_v2 = vadd.f32 %v1108_v20, %v1107_v39  ;;  %v1016_v14 = vsub.f32 %v1000_v26, %v982_v48 }
 0x33a   : > { %v1002_v22 = vadd.f32 %v853_v34, %v1714_v9 }
 0x33b   : > { %v1111_v47 = vadd.f32 %v1110_v1, %v1109_v2  ;;  %v1083_v51 = vsel %vm1067_vm15, %v1016_v14, 0.0 }
 0x33c   : > { %v1112_v40 = vsel %vm1086_vm3, %v1083_v51, 0.0  ;;  %v986_v4 = vpop.xlane.xlu1 %985 }
 0x33d   : > { %v1113_v3 = vadd.f32 %v1112_v40, %v1111_v47  ;;  %v1018_v50 = vsub.f32 %v1002_v22, %v986_v4 }
 0x33f   : > { %v1085_v37 = vsel %vm1069_vm0, %v1018_v50, 0.0  ;;  %v1115_v53 = vadd.f32 %v1114_v59, %v1113_v3 }
 0x340   : > { %v1116_v5 = vsel %vm1086_vm3, %v1085_v37, 0.0 }
 0x341   : > { %v1117_v55 = vadd.f32 %v1116_v5, %v1115_v53 }
 0x343   : > { %1118 = vadd.xlane.f32.xlu0 %v1117_v55 }
 0x3d0   : > { %v1119_v9 = vpop.xlane.xlu0 %1118 }
 0x3d1   : > { %v1120_v56 = vrot.slane %v1119_v9, 4 }
 0x3d3   : > { %v1121_v42 = vadd.f32 %v1120_v56, %v1119_v9 }
 0x3d5   : > { %v1122_v45 = vrot.slane %v1121_v42, 2 }
 0x3d7   : > { %v1123_v52 = vadd.f32 %v1122_v45, %v1121_v42 }
 0x3d9   : > { %v1124_v57 = vrot.slane %v1123_v52, 1 }
 0x3db   : > { %v1125_v58 = vadd.f32 %v1124_v57, %v1123_v52 }
 0x3dd   : > { %1330 = vpush %v1125_v58 }
 0x40e   : > { %s1331_s15 = spop %1330 }
 0x40f   : > { %v1127_v10 = vstv %s1331_s15 }
 0x410   : > { %1128 = vst [vmem:[%s300_s14] sm:$0xff] %v1127_v10 }
 0x411 PF: > { %s17_s24 = sadd.s32 1, %s1437_s24  }
 0x412   : > { %p14_p5 = scmp.ge.s32.totalorder %s17_s24, 4  }
 0x414   :  { %16 = sbr.rel (!%p14_p5) target bundleno = 1 (0x1), region = 81 }

</bundles_post_ra>
